<compile_context>
chip_gen: v6e
topology: v6e:2x2x1
jax: 0.10.0
libtpu: 0.0.40
codegen_flags: <defaults>
</compile_context>

<pallas_src>
import functools
import math

import jax
import jax.numpy as jnp
from jax import lax
from jax.experimental import pallas as pl
from jax.experimental.pallas import tpu as pltpu

# Module hyper-parameters (constructor args), baked in as constants.
TEMPERATURE = 0.5
BASE_TEMPERATURE = 0.07
NEGATIVES_WEIGHT = 1.0
EPS_0 = 0.1
EPS_1 = 0.1
MINORITY_CLS = 0  # required by the torch module when labels are given (unused in outputs)


def _consup_proto_kernel(anchors_ref, protos_ref, spm_ref, loss_ref, clean_ref,
                         *, tm, n_anchor, bsz, n_views):
    """Per grid step: one row-block of `tm` anchors.

    anchors_ref: (N, Dp)  bf16, resident across the grid (RHS of both matmuls).
    protos_ref : (16, Dp) bf16, prototypes padded to 16 rows by repeating row 0.
    spm_ref    : (N, 2)   f32, resident duplicated one-hot prototype selectors.
    loss_ref   : (tm, 1)  f32 per-anchor loss.
    clean_ref  : (tm, N-1) f32 exp_logits with the diagonal element removed per row.
    """
    N = n_anchor
    r0 = pl.multiple_of(pl.program_id(0) * tm, tm)

    a_all = anchors_ref[...]                       # (N, Dp)  bf16
    a_blk = anchors_ref[pl.ds(r0, tm), :]          # (tm, Dp) bf16
    protos = protos_ref[...]                       # (16, Dp) bf16
    spm = spm_ref[pl.ds(r0, tm), :]                # (tm, 2)  f32 (resident -> no per-step DMA)

    # ---- similarities on the MXU: contract last dims, no explicit transpose -----
    dims = (((1,), (1,)), ((), ()))
    sims_a = lax.dot_general(a_blk, a_all, dims,
                             preferred_element_type=jnp.float32)     # (tm, N)
    sims_p = lax.dot_general(a_blk, protos, dims,
                             preferred_element_type=jnp.float32)     # (tm, 16)

    inv_t = jnp.float32(1.0 / TEMPERATURE)
    adc_a = sims_a * inv_t
    # rows 2..15 of protos duplicate proto 0 -> max over prototype columns unchanged.
    lmax = jnp.maximum(jnp.max(adc_a, axis=1, keepdims=True),
                       inv_t * jnp.max(sims_p, axis=1, keepdims=True))   # (tm, 1)
    logits_a = adc_a - lmax                         # (tm, N)
    logits_p = sims_p[:, 0:2] * inv_t - lmax        # (tm, 2) prototype columns

    # ---- masks from a single delta = row - col -----------------------------------
    row = r0 + lax.broadcasted_iota(jnp.int32, (tm, N), 0)            # global row index
    col = lax.broadcasted_iota(jnp.int32, (tm, N), 1)
    delta = row - col                                                  # (tm, N) i32
    off_diag = delta != 0
    if bsz & (bsz - 1) == 0:                        # power-of-two batch: bitwise AND
        same_sample = (delta & (bsz - 1)) == 0
    else:                                           # single modulo otherwise
        same_sample = (delta % bsz) == 0
    pos = off_diag & same_sample                    # positives mask (bool)

    # ---- softmax denominator (prototype columns excluded by construction) --------
    e = jnp.exp(logits_a)                                              # (tm, N)
    exp_off = jnp.where(off_diag, e, 0.0)
    log_denom = jnp.log(jnp.sum(exp_off, axis=1, keepdims=True))       # (tm, 1)
    if NEGATIVES_WEIGHT != 1.0:
        log_denom = log_denom + jnp.float32(math.log(NEGATIVES_WEIGHT))

    # ---- prototype pull mask (m_pull) --------------------------------------------
    sim_p1 = sims_p[:, 0:1]
    sim_p2 = sims_p[:, 1:2]
    p1 = ((sim_p1 <= sim_p2 + EPS_0) & (spm[:, 0:1] > 0.5)).astype(jnp.float32)
    p2 = ((sim_p2 <= sim_p1 + EPS_1) & (spm[:, 1:2] > 0.5)).astype(jnp.float32)

    # ---- mean log-prob over positives: log_denom factored out of the (tm,N) sum ---
    pos_sum = jnp.sum(jnp.where(pos, logits_a, 0.0), axis=1, keepdims=True)
    s_total = pos_sum + p1 * logits_p[:, 0:1] + p2 * logits_p[:, 1:2]
    # count of same-sample positives per anchor is exactly (n_views - 1)
    cnt = jnp.float32(n_views - 1) + p1 + p2
    cnt_c = jnp.where(cnt < 1e-6, 1.0, cnt)
    mean_lp = (s_total - cnt * log_denom) / cnt_c                      # exact divide
    loss_ref[...] = (-(TEMPERATURE / BASE_TEMPERATURE)) * mean_lp

    # ---- fused diagonal removal: clean[r, c] = e[r, c + (c >= r)] ------------------
    # TODO(synk): confirm in the Mosaic dump that the 1-lane-shifted slice lowers to an
    #             XLU roll (not a materialized VMEM copy); if not, use pltpu.roll.
    head = e[:, 0:N - 1]
    tail = e[:, 1:N]
    clean_ref[...] = jnp.where(delta[:, 0:N - 1] > 0, head, tail)


def _select_tiling(n_rows, d_pad):
    """Pick the row tile (tm) and the scoped-VMEM limit per TPU generation.

    Budget ~14 live f32 (tm, N) temporaries + double-buffered outputs + the
    single-buffered resident operands, and keep the whole working set under ~70% of
    physical VMEM (limit set to 80% for compiler headroom). Prefer >= 4 grid steps so
    a megacore split still leaves 2 steps per TensorCore.
    """
    try:
        vmem_cap = int(pltpu.get_tpu_info().vmem_capacity_bytes)
    except Exception:
        vmem_cap = 64 * 1024 * 1024   # conservative fallback (v7x per-TC capacity)
    vmem_limit = int(vmem_cap * 0.80)
    budget = int(vmem_cap * 0.70)

    resident = (n_rows * d_pad * 2                      # anchors bf16 (single buffer)
                + 16 * d_pad * 2                        # prototypes bf16
                + ((n_rows + 7) // 8) * 8 * 128 * 4)    # spm f32, lane-padded

    def fits(tm):
        live = 14 * tm * n_rows * 4                     # (tm, N) f32/i32 epilogue temporaries
        live += 2 * tm * d_pad * 2                      # a_blk slice (bf16), possible copy
        outs = 2 * (tm * 128 * 4 + tm * max(n_rows - 1, 1) * 4)   # double-buffered outputs
        return resident + live + outs + (2 << 20) <= budget

    cands = [c for c in (512, 256, 128, 64, 32, 16, 8) if c <= n_rows and n_rows % c == 0]
    if not cands:
        cands = [n_rows]                                # tiny/awkward N: single full block
    for min_steps in (4, 2, 1):
        picks = [tm for tm in cands if n_rows // tm >= min_steps and fits(tm)]
        if picks:
            return picks[0], vmem_limit
    return cands[-1], vmem_limit


def consup_prototype_loss(features, labels, prototypes):
    """features: (bsz, n_views, D) f32, labels: (bsz, 2) one-hot f32, prototypes: (2, D) f32."""
    bsz, n_views, d = features.shape
    assert prototypes.shape[0] == 2
    N = bsz * n_views

    # torch.cat(torch.unbind(features, 1), 0) (view-major anchor order), pad D to 128, bf16.
    d_pad = -(-d // 128) * 128
    anchors = jnp.transpose(features, (1, 0, 2)).reshape(N, d)
    anchors = jnp.pad(anchors, ((0, 0), (0, d_pad - d))).astype(jnp.bfloat16)
    # Prototypes padded to 16 rows (bf16 sublane packing) by repeating row 0.
    protos16 = jnp.concatenate([prototypes, jnp.broadcast_to(prototypes[:1], (14, d))], axis=0)
    protos16 = jnp.pad(protos16, ((0, 0), (0, d_pad - d))).astype(jnp.bfloat16)
    # selected_prototypes_mask = cat([labels]*n_views, 0)  (torch path assumes n_views == 2)
    spm = jnp.tile(labels.astype(jnp.float32), (n_views, 1))            # (N, 2)

    tm, vmem_limit = _select_tiling(N, d_pad)
    grid = (N // tm,)

    kernel = functools.partial(_consup_proto_kernel, tm=tm, n_anchor=N, bsz=bsz, n_views=n_views)

    def build(single_buffer):
        def res_spec(shape):
            if single_buffer:
                return pl.BlockSpec(shape, lambda i: (0, 0), pipeline_mode=pl.Buffered(1))
            return pl.BlockSpec(shape, lambda i: (0, 0))
        return pl.pallas_call(
            kernel,
            out_shape=(
                jax.ShapeDtypeStruct((N, 1), jnp.float32),
                jax.ShapeDtypeStruct((N, N - 1), jnp.float32),
            ),
            grid_spec=pltpu.PrefetchScalarGridSpec(
                num_scalar_prefetch=0,
                grid=grid,
                in_specs=[
                    res_spec((N, d_pad)),      # anchors, resident, single-buffered
                    res_spec((16, d_pad)),     # prototypes, resident
                    res_spec((N, 2)),          # spm, resident (no per-step 2-lane DMA)
                ],
                out_specs=(
                    pl.BlockSpec((tm, 1), lambda i: (i, 0)),
                    pl.BlockSpec((tm, N - 1), lambda i: (i, 0)),
                ),
            ),
            compiler_params=pltpu.CompilerParams(
                dimension_semantics=("parallel",),
                vmem_limit_bytes=vmem_limit,
            ),
        )

    try:
        per_anchor, clean_logits = build(True)(anchors, protos16, spm)
    except Exception:
        # pipeline_mode=pl.Buffered(1) not supported on this jax build: default buffering.
        per_anchor, clean_logits = build(False)(anchors, protos16, spm)

    loss = jnp.mean(per_anchor)

    out_labels = jnp.concatenate(
        [jnp.arange(bsz, dtype=jnp.int32) + bsz - 1,
         jnp.arange(bsz, dtype=jnp.int32)], axis=0)
    # TODO(synk): torch returns int64 labels; int32 used here (JAX x64 disabled).
    return loss, clean_logits, out_labels


def _reference(features, labels, prototypes):
    """Plain-JAX mirror of the torch forward (bf16 matmul inputs to match the kernel)."""
    bsz, V, d = features.shape
    N, P = bsz * V, prototypes.shape[0]
    cf = jnp.concatenate([jnp.transpose(features, (1, 0, 2)).reshape(N, d), prototypes], 0)
    cfb = cf.astype(jnp.bfloat16)
    sims = jnp.dot(cfb, cfb.T, preferred_element_type=jnp.float32)
    adc = sims / TEMPERATURE
    logits = adc - jnp.max(adc, axis=1, keepdims=True)
    mask = jnp.tile(jnp.eye(bsz, dtype=jnp.float32), (V, V))
    logits_mask = 1.0 - jnp.eye(N, dtype=jnp.float32)
    mask = mask * logits_mask
    spm = jnp.tile(labels.astype(jnp.float32), (V, 1))
    logits_mask = jnp.concatenate([logits_mask, jnp.zeros((N, P), jnp.float32)], 1)
    logits = logits[:N, :]
    exp_logits = jnp.exp(logits) * logits_mask
    log_prob = logits - jnp.log(NEGATIVES_WEIGHT * exp_logits.sum(1, keepdims=True))
    cond2 = sims[:N, -1] <= sims[:N, -2] + EPS_1
    cond1 = sims[:N, -2] <= sims[:N, -1] + EPS_0
    p2 = jnp.logical_and(cond2, spm[:, -1] > 0.5)
    p1 = jnp.logical_and(cond1, spm[:, -2] > 0.5)
    m_pull = jnp.stack([p1, p2], 1).astype(jnp.float32)
    mask_full = jnp.concatenate([mask, m_pull], 1)
    mpp = mask_full.sum(1)
    mpp = jnp.where(mpp < 1e-6, 1.0, mpp)
    mlpp = (mask_full * log_prob).sum(1) / mpp
    loss = jnp.mean(-(TEMPERATURE / BASE_TEMPERATURE) * mlpp)
    exp_logits = exp_logits[:, :N]
    i = jnp.arange(N)[:, None]
    j = jnp.arange(N - 1)[None, :]
    idx = j + (j >= i).astype(jnp.int32)
    clean = jnp.take_along_axis(exp_logits, idx, axis=1)
    out_labels = jnp.concatenate(
        [jnp.arange(bsz, dtype=jnp.int32) + bsz - 1, jnp.arange(bsz, dtype=jnp.int32)], 0)
    return loss, clean, out_labels


if __name__ == "__main__":
    key = jax.random.PRNGKey(0)
    k1, k2 = jax.random.split(key)
    bsz, n_views, d = 8, 2, 32   # N = 16 -> row tile 8, grid of 2

    feats = jax.random.normal(k1, (bsz, n_views, d), jnp.float32)
    feats = feats / jnp.linalg.norm(feats, axis=-1, keepdims=True)
    cls = jnp.array([0, 1, 0, 1, 0, 0, 1, 1], jnp.int32)
    # labels[:, 1] is the binary class; rows are one-hot prototype selectors.
    labels = jnp.stack([1 - cls, cls], axis=1).astype(jnp.float32)       # (bsz, 2)
    protos = jax.random.normal(k2, (2, d), jnp.float32)
    protos = protos / jnp.linalg.norm(protos, axis=-1, keepdims=True)    # (2, D)

    loss, clean_logits, out_labels = consup_prototype_loss(feats, labels, protos)
    jax.block_until_ready((loss, clean_logits, out_labels))

    ref_loss, ref_clean, ref_labels = _reference(feats, labels, protos)
    # exact divide on the positive count -> tolerance tightened vs the previous version.
    assert jnp.allclose(loss, ref_loss, atol=2e-3, rtol=2e-3), (loss, ref_loss)
    assert jnp.allclose(clean_logits, ref_clean, atol=1e-3, rtol=1e-3)
    assert jnp.array_equal(out_labels, ref_labels)

    print("KERNEL_OK")
</pallas_src>

<mosaic_0001>
module attributes {stable_mosaic.version = 11 : i64} {
  func.func @_consup_proto_kernel(%arg0: i32, %arg1: memref<16x128xbf16, #tpu.memory_space<vmem>>, %arg2: memref<16x128xbf16, #tpu.memory_space<vmem>>, %arg3: memref<16x2xf32, #tpu.memory_space<vmem>>, %arg4: memref<8x1xf32, #tpu.memory_space<vmem>>, %arg5: memref<8x15xf32, #tpu.memory_space<vmem>>) attributes {dimension_semantics = [#tpu.dimension_semantics<parallel>], iteration_bounds = array<i64: 2>, scalar_prefetch = 0 : i64, scratch_operands = 0 : i64, tpu.core_type = #tpu.core_type<tc>, window_params = [{pipeline_mode = #tpu.pipeline_mode<synchronous>, transform_indices = @transform_0, window_bounds = array<i64: 16, 128>}, {pipeline_mode = #tpu.pipeline_mode<synchronous>, transform_indices = @transform_1, window_bounds = array<i64: 16, 128>}, {pipeline_mode = #tpu.pipeline_mode<synchronous>, transform_indices = @transform_2, window_bounds = array<i64: 16, 2>}, {transform_indices = @transform_3, window_bounds = array<i64: 8, 1>}, {transform_indices = @transform_4, window_bounds = array<i64: 8, 15>}]} {
    %c8_i32 = arith.constant 8 : i32
    %0 = arith.muli %arg0, %c8_i32 : i32
    %1 = tpu.assume_multiple %0, 8 : i32
    %c0 = arith.constant 0 : index
    %c0_0 = arith.constant 0 : index
    %2 = vector.load %arg1[%c0, %c0_0] : memref<16x128xbf16, #tpu.memory_space<vmem>>, vector<16x128xbf16>
    %3 = arith.index_cast %1 : i32 to index
    %c0_1 = arith.constant 0 : index
    %4 = vector.load %arg1[%3, %c0_1] : memref<16x128xbf16, #tpu.memory_space<vmem>>, vector<8x128xbf16>
    %c0_2 = arith.constant 0 : index
    %c0_3 = arith.constant 0 : index
    %5 = vector.load %arg2[%c0_2, %c0_3] : memref<16x128xbf16, #tpu.memory_space<vmem>>, vector<16x128xbf16>
    %6 = arith.index_cast %1 : i32 to index
    %c0_4 = arith.constant 0 : index
    %7 = vector.load %arg3[%6, %c0_4] : memref<16x2xf32, #tpu.memory_space<vmem>>, vector<8x2xf32>
    %cst = arith.constant dense<0.000000e+00> : vector<8x16xf32>
    %8 = tpu.matmul %4, %2, %cst {dimension_numbers = #tpu.dot_dimension_numbers<[1], [1], [0], [0], [0, 0, 1, 0], [], []>} : vector<8x128xbf16>, vector<16x128xbf16>, vector<8x16xf32> -> vector<8x16xf32>
    %cst_5 = arith.constant dense<0.000000e+00> : vector<8x16xf32>
    %9 = tpu.matmul %4, %5, %cst_5 {dimension_numbers = #tpu.dot_dimension_numbers<[1], [1], [0], [0], [0, 0, 1, 0], [], []>} : vector<8x128xbf16>, vector<16x128xbf16>, vector<8x16xf32> -> vector<8x16xf32>
    %cst_6 = arith.constant 2.000000e+00 : f32
    %10 = vector.broadcast %cst_6 : f32 to vector<8x16xf32>
    %11 = arith.mulf %8, %10 : vector<8x16xf32>
    %cst_7 = arith.constant dense<0xFF800000> : vector<8xf32>
    %12 = vector.multi_reduction <maximumf>, %11, %cst_7 [1] : vector<8x16xf32> to vector<8xf32>
    %13 = vector.shape_cast %12 : vector<8xf32> to vector<8x1xf32>
    %cst_8 = arith.constant dense<0xFF800000> : vector<8xf32>
    %14 = vector.multi_reduction <maximumf>, %9, %cst_8 [1] : vector<8x16xf32> to vector<8xf32>
    %15 = vector.shape_cast %14 : vector<8xf32> to vector<8x1xf32>
    %cst_9 = arith.constant 2.000000e+00 : f32
    %16 = vector.broadcast %cst_9 : f32 to vector<8x1xf32>
    %17 = arith.mulf %16, %15 : vector<8x1xf32>
    %18 = arith.maximumf %13, %17 : vector<8x1xf32>
    %19 = vector.broadcast %18 : vector<8x1xf32> to vector<8x16xf32>
    %20 = arith.subf %11, %19 : vector<8x16xf32>
    %21 = vector.extract_strided_slice %9 {offsets = [0, 0], sizes = [8, 2], strides = [1, 1]} : vector<8x16xf32> to vector<8x2xf32>
    %cst_10 = arith.constant 2.000000e+00 : f32
    %22 = vector.broadcast %cst_10 : f32 to vector<8x2xf32>
    %23 = arith.mulf %21, %22 : vector<8x2xf32>
    %24 = vector.broadcast %18 : vector<8x1xf32> to vector<8x2xf32>
    %25 = arith.subf %23, %24 : vector<8x2xf32>
    %26 = tpu.iota {dimensions = array<i32: 0>} : vector<8x16xi32>
    %27 = vector.broadcast %1 : i32 to vector<8x16xi32>
    %28 = arith.addi %27, %26 : vector<8x16xi32>
    %29 = tpu.iota {dimensions = array<i32: 1>} : vector<8x16xi32>
    %30 = arith.subi %28, %29 : vector<8x16xi32>
    %c0_i32 = arith.constant 0 : i32
    %31 = vector.broadcast %c0_i32 : i32 to vector<8x16xi32>
    %32 = arith.cmpi ne, %30, %31 : vector<8x16xi32>
    %c7_i32 = arith.constant 7 : i32
    %33 = vector.broadcast %c7_i32 : i32 to vector<8x16xi32>
    %34 = arith.andi %30, %33 : vector<8x16xi32>
    %c0_i32_11 = arith.constant 0 : i32
    %35 = vector.broadcast %c0_i32_11 : i32 to vector<8x16xi32>
    %36 = arith.cmpi eq, %34, %35 : vector<8x16xi32>
    %37 = arith.andi %32, %36 : vector<8x16xi1>
    %38 = math.exp %20 : vector<8x16xf32>
    %cst_12 = arith.constant 0.000000e+00 : f32
    %39 = vector.broadcast %cst_12 : f32 to vector<8x16xf32>
    %40 = arith.select %32, %38, %39 : vector<8x16xi1>, vector<8x16xf32>
    %cst_13 = arith.constant dense<0.000000e+00> : vector<8xf32>
    %41 = vector.multi_reduction <add>, %40, %cst_13 [1] : vector<8x16xf32> to vector<8xf32>
    %42 = vector.shape_cast %41 : vector<8xf32> to vector<8x1xf32>
    %43 = math.log %42 : vector<8x1xf32>
    %44 = vector.extract_strided_slice %9 {offsets = [0, 0], sizes = [8, 1], strides = [1, 1]} : vector<8x16xf32> to vector<8x1xf32>
    %45 = vector.extract_strided_slice %9 {offsets = [0, 1], sizes = [8, 1], strides = [1, 1]} : vector<8x16xf32> to vector<8x1xf32>
    %cst_14 = arith.constant 1.000000e-01 : f32
    %46 = vector.broadcast %cst_14 : f32 to vector<8x1xf32>
    %47 = arith.addf %45, %46 : vector<8x1xf32>
    %48 = arith.cmpf ole, %44, %47 : vector<8x1xf32>
    %49 = vector.extract_strided_slice %7 {offsets = [0, 0], sizes = [8, 1], strides = [1, 1]} : vector<8x2xf32> to vector<8x1xf32>
    %cst_15 = arith.constant 5.000000e-01 : f32
    %50 = vector.broadcast %cst_15 : f32 to vector<8x1xf32>
    %51 = arith.cmpf ogt, %49, %50 : vector<8x1xf32>
    %52 = arith.andi %48, %51 : vector<8x1xi1>
    %53 = arith.extui %52 : vector<8x1xi1> to vector<8x1xi32>
    %54 = arith.sitofp %53 : vector<8x1xi32> to vector<8x1xf32>
    %cst_16 = arith.constant 1.000000e-01 : f32
    %55 = vector.broadcast %cst_16 : f32 to vector<8x1xf32>
    %56 = arith.addf %44, %55 : vector<8x1xf32>
    %57 = arith.cmpf ole, %45, %56 : vector<8x1xf32>
    %58 = vector.extract_strided_slice %7 {offsets = [0, 1], sizes = [8, 1], strides = [1, 1]} : vector<8x2xf32> to vector<8x1xf32>
    %cst_17 = arith.constant 5.000000e-01 : f32
    %59 = vector.broadcast %cst_17 : f32 to vector<8x1xf32>
    %60 = arith.cmpf ogt, %58, %59 : vector<8x1xf32>
    %61 = arith.andi %57, %60 : vector<8x1xi1>
    %62 = arith.extui %61 : vector<8x1xi1> to vector<8x1xi32>
    %63 = arith.sitofp %62 : vector<8x1xi32> to vector<8x1xf32>
    %cst_18 = arith.constant 0.000000e+00 : f32
    %64 = vector.broadcast %cst_18 : f32 to vector<8x16xf32>
    %65 = arith.select %37, %20, %64 : vector<8x16xi1>, vector<8x16xf32>
    %cst_19 = arith.constant dense<0.000000e+00> : vector<8xf32>
    %66 = vector.multi_reduction <add>, %65, %cst_19 [1] : vector<8x16xf32> to vector<8xf32>
    %67 = vector.shape_cast %66 : vector<8xf32> to vector<8x1xf32>
    %68 = vector.extract_strided_slice %25 {offsets = [0, 0], sizes = [8, 1], strides = [1, 1]} : vector<8x2xf32> to vector<8x1xf32>
    %69 = arith.mulf %54, %68 : vector<8x1xf32>
    %70 = arith.addf %67, %69 : vector<8x1xf32>
    %71 = vector.extract_strided_slice %25 {offsets = [0, 1], sizes = [8, 1], strides = [1, 1]} : vector<8x2xf32> to vector<8x1xf32>
    %72 = arith.mulf %63, %71 : vector<8x1xf32>
    %73 = arith.addf %70, %72 : vector<8x1xf32>
    %cst_20 = arith.constant 1.000000e+00 : f32
    %74 = vector.broadcast %cst_20 : f32 to vector<8x1xf32>
    %75 = arith.addf %74, %54 : vector<8x1xf32>
    %76 = arith.addf %75, %63 : vector<8x1xf32>
    %cst_21 = arith.constant 9.99999997E-7 : f32
    %77 = vector.broadcast %cst_21 : f32 to vector<8x1xf32>
    %78 = arith.cmpf olt, %76, %77 : vector<8x1xf32>
    %cst_22 = arith.constant 1.000000e+00 : f32
    %79 = vector.broadcast %cst_22 : f32 to vector<8x1xf32>
    %80 = arith.select %78, %79, %76 : vector<8x1xi1>, vector<8x1xf32>
    %81 = arith.mulf %76, %43 : vector<8x1xf32>
    %82 = arith.subf %73, %81 : vector<8x1xf32>
    %83 = arith.divf %82, %80 : vector<8x1xf32>
    %cst_23 = arith.constant -7.14285707 : f32
    %84 = vector.broadcast %cst_23 : f32 to vector<8x1xf32>
    %85 = arith.mulf %84, %83 : vector<8x1xf32>
    %c0_24 = arith.constant 0 : index
    %c0_25 = arith.constant 0 : index
    %86 = vector.load %arg4[%c0_24, %c0_25] : memref<8x1xf32, #tpu.memory_space<vmem>>, vector<8x1xf32>
    tpu.vector_store %arg4[%c0_24, %c0_25], %85 {strides = array<i32>} : memref<8x1xf32, #tpu.memory_space<vmem>>, vector<8x1xf32>,
    %87 = vector.extract_strided_slice %38 {offsets = [0, 0], sizes = [8, 15], strides = [1, 1]} : vector<8x16xf32> to vector<8x15xf32>
    %88 = vector.extract_strided_slice %38 {offsets = [0, 1], sizes = [8, 15], strides = [1, 1]} : vector<8x16xf32> to vector<8x15xf32>
    %89 = vector.extract_strided_slice %30 {offsets = [0, 0], sizes = [8, 15], strides = [1, 1]} : vector<8x16xi32> to vector<8x15xi32>
    %c0_i32_26 = arith.constant 0 : i32
    %90 = vector.broadcast %c0_i32_26 : i32 to vector<8x15xi32>
    %91 = arith.cmpi sgt, %89, %90 : vector<8x15xi32>
    %92 = arith.select %91, %87, %88 : vector<8x15xi1>, vector<8x15xf32>
    %c0_27 = arith.constant 0 : index
    %c0_28 = arith.constant 0 : index
    %93 = vector.load %arg5[%c0_27, %c0_28] : memref<8x15xf32, #tpu.memory_space<vmem>>, vector<8x15xf32>
    tpu.vector_store %arg5[%c0_27, %c0_28], %92 {strides = array<i32>} : memref<8x15xf32, #tpu.memory_space<vmem>>, vector<8x15xf32>,
    return
  }
  func.func @transform_0(%arg0: i32) -> (i32, i32) {
    %c0_i32 = arith.constant 0 : i32
    %c0_i32_0 = arith.constant 0 : i32
    %c0_i32_1 = arith.constant 0 : i32
    return %c0_i32, %c0_i32_0 : i32, i32
  }
  func.func @transform_1(%arg0: i32) -> (i32, i32) {
    %c0_i32 = arith.constant 0 : i32
    %c0_i32_0 = arith.constant 0 : i32
    %c0_i32_1 = arith.constant 0 : i32
    return %c0_i32, %c0_i32_0 : i32, i32
  }
  func.func @transform_2(%arg0: i32) -> (i32, i32) {
    %c0_i32 = arith.constant 0 : i32
    %c0_i32_0 = arith.constant 0 : i32
    %c0_i32_1 = arith.constant 0 : i32
    return %c0_i32, %c0_i32_0 : i32, i32
  }
  func.func @transform_3(%arg0: i32) -> (i32, i32) {
    %c0_i32 = arith.constant 0 : i32
    %c0_i32_0 = arith.constant 0 : i32
    return %arg0, %c0_i32 : i32, i32
  }
  func.func @transform_4(%arg0: i32) -> (i32, i32) {
    %c0_i32 = arith.constant 0 : i32
    %c0_i32_0 = arith.constant 0 : i32
    return %arg0, %c0_i32 : i32, i32
  }
}

module attributes {stable_mosaic.version = 11 : i64} {
  func.func @_consup_proto_kernel(%arg0: i32, %arg1: memref<16x128xbf16, #tpu.memory_space<vmem>>, %arg2: memref<16x128xbf16, #tpu.memory_space<vmem>>, %arg3: memref<16x2xf32, #tpu.memory_space<vmem>>, %arg4: memref<8x1xf32, #tpu.memory_space<vmem>>, %arg5: memref<8x15xf32, #tpu.memory_space<vmem>>) attributes {dimension_semantics = [#tpu.dimension_semantics<parallel>], iteration_bounds = array<i64: 2>, scalar_prefetch = 0 : i64, scratch_operands = 0 : i64, tpu.core_type = #tpu.core_type<tc>, window_params = [{pipeline_mode = #tpu.pipeline_mode<synchronous>, transform_indices = @transform_0, window_bounds = array<i64: 16, 128>}, {pipeline_mode = #tpu.pipeline_mode<synchronous>, transform_indices = @transform_1, window_bounds = array<i64: 16, 128>}, {pipeline_mode = #tpu.pipeline_mode<synchronous>, transform_indices = @transform_2, window_bounds = array<i64: 16, 2>}, {transform_indices = @transform_3, window_bounds = array<i64: 8, 1>}, {transform_indices = @transform_4, window_bounds = array<i64: 8, 15>}]} {
    %c8_i32 = arith.constant 8 : i32
    %0 = arith.muli %arg0, %c8_i32 : i32
    %1 = tpu.assume_multiple %0, 8 : i32
    %c0 = arith.constant 0 : index
    %c0_0 = arith.constant 0 : index
    %2 = vector.load %arg1[%c0, %c0_0] : memref<16x128xbf16, #tpu.memory_space<vmem>>, vector<16x128xbf16>
    %3 = arith.index_cast %1 : i32 to index
    %c0_1 = arith.constant 0 : index
    %4 = vector.load %arg1[%3, %c0_1] : memref<16x128xbf16, #tpu.memory_space<vmem>>, vector<8x128xbf16>
    %c0_2 = arith.constant 0 : index
    %c0_3 = arith.constant 0 : index
    %5 = vector.load %arg2[%c0_2, %c0_3] : memref<16x128xbf16, #tpu.memory_space<vmem>>, vector<16x128xbf16>
    %6 = arith.index_cast %1 : i32 to index
    %c0_4 = arith.constant 0 : index
    %7 = vector.load %arg3[%6, %c0_4] : memref<16x2xf32, #tpu.memory_space<vmem>>, vector<8x2xf32>
    %cst = arith.constant dense<0.000000e+00> : vector<8x16xf32>
    %8 = tpu.matmul %4, %2, %cst {dimension_numbers = #tpu.dot_dimension_numbers<[1], [1], [0], [0], [0, 0, 1, 0], [], []>} : vector<8x128xbf16>, vector<16x128xbf16>, vector<8x16xf32> -> vector<8x16xf32>
    %cst_5 = arith.constant dense<0.000000e+00> : vector<8x16xf32>
    %9 = tpu.matmul %4, %5, %cst_5 {dimension_numbers = #tpu.dot_dimension_numbers<[1], [1], [0], [0], [0, 0, 1, 0], [], []>} : vector<8x128xbf16>, vector<16x128xbf16>, vector<8x16xf32> -> vector<8x16xf32>
    %cst_6 = arith.constant 2.000000e+00 : f32
    %10 = vector.broadcast %cst_6 : f32 to vector<8x16xf32>
    %11 = arith.mulf %8, %10 : vector<8x16xf32>
    %cst_7 = arith.constant dense<0xFF800000> : vector<8xf32>
    %12 = vector.multi_reduction <maximumf>, %11, %cst_7 [1] : vector<8x16xf32> to vector<8xf32>
    %13 = vector.shape_cast %12 : vector<8xf32> to vector<8x1xf32>
    %cst_8 = arith.constant dense<0xFF800000> : vector<8xf32>
    %14 = vector.multi_reduction <maximumf>, %9, %cst_8 [1] : vector<8x16xf32> to vector<8xf32>
    %15 = vector.shape_cast %14 : vector<8xf32> to vector<8x1xf32>
    %cst_9 = arith.constant 2.000000e+00 : f32
    %16 = vector.broadcast %cst_9 : f32 to vector<8x1xf32>
    %17 = arith.mulf %16, %15 : vector<8x1xf32>
    %18 = arith.maximumf %13, %17 : vector<8x1xf32>
    %19 = vector.broadcast %18 : vector<8x1xf32> to vector<8x16xf32>
    %20 = arith.subf %11, %19 : vector<8x16xf32>
    %21 = vector.extract_strided_slice %9 {offsets = [0, 0], sizes = [8, 2], strides = [1, 1]} : vector<8x16xf32> to vector<8x2xf32>
    %cst_10 = arith.constant 2.000000e+00 : f32
    %22 = vector.broadcast %cst_10 : f32 to vector<8x2xf32>
    %23 = arith.mulf %21, %22 : vector<8x2xf32>
    %24 = vector.broadcast %18 : vector<8x1xf32> to vector<8x2xf32>
    %25 = arith.subf %23, %24 : vector<8x2xf32>
    %26 = tpu.iota {dimensions = array<i32: 0>} : vector<8x16xi32>
    %27 = vector.broadcast %1 : i32 to vector<8x16xi32>
    %28 = arith.addi %27, %26 : vector<8x16xi32>
    %29 = tpu.iota {dimensions = array<i32: 1>} : vector<8x16xi32>
    %30 = arith.subi %28, %29 : vector<8x16xi32>
    %c0_i32 = arith.constant 0 : i32
    %31 = vector.broadcast %c0_i32 : i32 to vector<8x16xi32>
    %32 = arith.cmpi ne, %30, %31 : vector<8x16xi32>
    %c7_i32 = arith.constant 7 : i32
    %33 = vector.broadcast %c7_i32 : i32 to vector<8x16xi32>
    %34 = arith.andi %30, %33 : vector<8x16xi32>
    %c0_i32_11 = arith.constant 0 : i32
    %35 = vector.broadcast %c0_i32_11 : i32 to vector<8x16xi32>
    %36 = arith.cmpi eq, %34, %35 : vector<8x16xi32>
    %37 = arith.andi %32, %36 : vector<8x16xi1>
    %38 = math.exp %20 : vector<8x16xf32>
    %cst_12 = arith.constant 0.000000e+00 : f32
    %39 = vector.broadcast %cst_12 : f32 to vector<8x16xf32>
    %40 = arith.select %32, %38, %39 : vector<8x16xi1>, vector<8x16xf32>
    %cst_13 = arith.constant dense<0.000000e+00> : vector<8xf32>
    %41 = vector.multi_reduction <add>, %40, %cst_13 [1] : vector<8x16xf32> to vector<8xf32>
    %42 = vector.shape_cast %41 : vector<8xf32> to vector<8x1xf32>
    %43 = math.log %42 : vector<8x1xf32>
    %44 = vector.extract_strided_slice %9 {offsets = [0, 0], sizes = [8, 1], strides = [1, 1]} : vector<8x16xf32> to vector<8x1xf32>
    %45 = vector.extract_strided_slice %9 {offsets = [0, 1], sizes = [8, 1], strides = [1, 1]} : vector<8x16xf32> to vector<8x1xf32>
    %cst_14 = arith.constant 1.000000e-01 : f32
    %46 = vector.broadcast %cst_14 : f32 to vector<8x1xf32>
    %47 = arith.addf %45, %46 : vector<8x1xf32>
    %48 = arith.cmpf ole, %44, %47 : vector<8x1xf32>
    %49 = vector.extract_strided_slice %7 {offsets = [0, 0], sizes = [8, 1], strides = [1, 1]} : vector<8x2xf32> to vector<8x1xf32>
    %cst_15 = arith.constant 5.000000e-01 : f32
    %50 = vector.broadcast %cst_15 : f32 to vector<8x1xf32>
    %51 = arith.cmpf ogt, %49, %50 : vector<8x1xf32>
    %52 = arith.andi %48, %51 : vector<8x1xi1>
    %53 = arith.extui %52 : vector<8x1xi1> to vector<8x1xi32>
    %54 = arith.sitofp %53 : vector<8x1xi32> to vector<8x1xf32>
    %cst_16 = arith.constant 1.000000e-01 : f32
    %55 = vector.broadcast %cst_16 : f32 to vector<8x1xf32>
    %56 = arith.addf %44, %55 : vector<8x1xf32>
    %57 = arith.cmpf ole, %45, %56 : vector<8x1xf32>
    %58 = vector.extract_strided_slice %7 {offsets = [0, 1], sizes = [8, 1], strides = [1, 1]} : vector<8x2xf32> to vector<8x1xf32>
    %cst_17 = arith.constant 5.000000e-01 : f32
    %59 = vector.broadcast %cst_17 : f32 to vector<8x1xf32>
    %60 = arith.cmpf ogt, %58, %59 : vector<8x1xf32>
    %61 = arith.andi %57, %60 : vector<8x1xi1>
    %62 = arith.extui %61 : vector<8x1xi1> to vector<8x1xi32>
    %63 = arith.sitofp %62 : vector<8x1xi32> to vector<8x1xf32>
    %cst_18 = arith.constant 0.000000e+00 : f32
    %64 = vector.broadcast %cst_18 : f32 to vector<8x16xf32>
    %65 = arith.select %37, %20, %64 : vector<8x16xi1>, vector<8x16xf32>
    %cst_19 = arith.constant dense<0.000000e+00> : vector<8xf32>
    %66 = vector.multi_reduction <add>, %65, %cst_19 [1] : vector<8x16xf32> to vector<8xf32>
    %67 = vector.shape_cast %66 : vector<8xf32> to vector<8x1xf32>
    %68 = vector.extract_strided_slice %25 {offsets = [0, 0], sizes = [8, 1], strides = [1, 1]} : vector<8x2xf32> to vector<8x1xf32>
    %69 = arith.mulf %54, %68 : vector<8x1xf32>
    %70 = arith.addf %67, %69 : vector<8x1xf32>
    %71 = vector.extract_strided_slice %25 {offsets = [0, 1], sizes = [8, 1], strides = [1, 1]} : vector<8x2xf32> to vector<8x1xf32>
    %72 = arith.mulf %63, %71 : vector<8x1xf32>
    %73 = arith.addf %70, %72 : vector<8x1xf32>
    %cst_20 = arith.constant 1.000000e+00 : f32
    %74 = vector.broadcast %cst_20 : f32 to vector<8x1xf32>
    %75 = arith.addf %74, %54 : vector<8x1xf32>
    %76 = arith.addf %75, %63 : vector<8x1xf32>
    %cst_21 = arith.constant 9.99999997E-7 : f32
    %77 = vector.broadcast %cst_21 : f32 to vector<8x1xf32>
    %78 = arith.cmpf olt, %76, %77 : vector<8x1xf32>
    %cst_22 = arith.constant 1.000000e+00 : f32
    %79 = vector.broadcast %cst_22 : f32 to vector<8x1xf32>
    %80 = arith.select %78, %79, %76 : vector<8x1xi1>, vector<8x1xf32>
    %81 = arith.mulf %76, %43 : vector<8x1xf32>
    %82 = arith.subf %73, %81 : vector<8x1xf32>
    %83 = arith.divf %82, %80 : vector<8x1xf32>
    %cst_23 = arith.constant -7.14285707 : f32
    %84 = vector.broadcast %cst_23 : f32 to vector<8x1xf32>
    %85 = arith.mulf %84, %83 : vector<8x1xf32>
    %c0_24 = arith.constant 0 : index
    %c0_25 = arith.constant 0 : index
    %86 = vector.load %arg4[%c0_24, %c0_25] : memref<8x1xf32, #tpu.memory_space<vmem>>, vector<8x1xf32>
    tpu.vector_store %arg4[%c0_24, %c0_25], %85 {strides = array<i32>} : memref<8x1xf32, #tpu.memory_space<vmem>>, vector<8x1xf32>,
    %87 = vector.extract_strided_slice %38 {offsets = [0, 0], sizes = [8, 15], strides = [1, 1]} : vector<8x16xf32> to vector<8x15xf32>
    %88 = vector.extract_strided_slice %38 {offsets = [0, 1], sizes = [8, 15], strides = [1, 1]} : vector<8x16xf32> to vector<8x15xf32>
    %89 = vector.extract_strided_slice %30 {offsets = [0, 0], sizes = [8, 15], strides = [1, 1]} : vector<8x16xi32> to vector<8x15xi32>
    %c0_i32_26 = arith.constant 0 : i32
    %90 = vector.broadcast %c0_i32_26 : i32 to vector<8x15xi32>
    %91 = arith.cmpi sgt, %89, %90 : vector<8x15xi32>
    %92 = arith.select %91, %87, %88 : vector<8x15xi1>, vector<8x15xf32>
    %c0_27 = arith.constant 0 : index
    %c0_28 = arith.constant 0 : index
    %93 = vector.load %arg5[%c0_27, %c0_28] : memref<8x15xf32, #tpu.memory_space<vmem>>, vector<8x15xf32>
    tpu.vector_store %arg5[%c0_27, %c0_28], %92 {strides = array<i32>} : memref<8x15xf32, #tpu.memory_space<vmem>>, vector<8x15xf32>,
    return
  }
  func.func @transform_0(%arg0: i32) -> (i32, i32) {
    %c0_i32 = arith.constant 0 : i32
    %c0_i32_0 = arith.constant 0 : i32
    %c0_i32_1 = arith.constant 0 : i32
    return %c0_i32, %c0_i32_0 : i32, i32
  }
  func.func @transform_1(%arg0: i32) -> (i32, i32) {
    %c0_i32 = arith.constant 0 : i32
    %c0_i32_0 = arith.constant 0 : i32
    %c0_i32_1 = arith.constant 0 : i32
    return %c0_i32, %c0_i32_0 : i32, i32
  }
  func.func @transform_2(%arg0: i32) -> (i32, i32) {
    %c0_i32 = arith.constant 0 : i32
    %c0_i32_0 = arith.constant 0 : i32
    %c0_i32_1 = arith.constant 0 : i32
    return %c0_i32, %c0_i32_0 : i32, i32
  }
  func.func @transform_3(%arg0: i32) -> (i32, i32) {
    %c0_i32 = arith.constant 0 : i32
    %c0_i32_0 = arith.constant 0 : i32
    return %arg0, %c0_i32 : i32, i32
  }
  func.func @transform_4(%arg0: i32) -> (i32, i32) {
    %c0_i32 = arith.constant 0 : i32
    %c0_i32_0 = arith.constant 0 : i32
    return %arg0, %c0_i32 : i32, i32
  }
}

</mosaic_0001>

<bundles_post_ra>
// kernel: tpu_custom_call.1
= control target key start
LH: loop header
LB: loop body
LE: loop exit
PB: predicated region body
PF: predicated region fallthrough
CT: control target
= control target key end

     0   :  { %10 = vsyncpa [#allocation3], 0  ;;  %s775_s0 = inlined_call_operand.vmem [shape: bf16[16,128], index: 0, kind: input, shape index: {}]   ;;  %s776_s1 = inlined_call_operand.vmem [shape: bf16[16,128], index: 1, kind: input, shape index: {}]   ;;  %s777_s2 = inlined_call_operand.vmem [shape: f32[16,2], index: 2, kind: input, shape index: {}]   ;;  %s778_s3 = inlined_call_operand.vmem [shape: f32[16,1], index: 3, kind: output, shape index: {0}]   ;;  %s779_s4 = inlined_call_operand.hbm [shape: f32[16,15], index: 4, kind: output, shape index: {1}]  }
   0x1   :  { %12 = vsyncpa [#allocation3 + $0x1], 0  ;;  %s646_s15 = smov 0   ;;  %s648_s16 = smov 0  }
   0x2   :  { %s650_s17 = smov 0   ;;  %s652_s18 = smov 0  }
   0x3 LB: > { %s667_s19 = sadd.s32 4294967295, %s614_s18   ;;  %s472_s20 = sadd.s32 4294967294, %s614_s18   ;;  %s614_s18 = sphi %s652_s18, %s785_s18   ;;  %s610_s17 = sphi %s650_s17, %s784_s17   ;;  %s606_s16 = sphi %s648_s16, %s783_s16   ;;  %s602_s15 = sphi %s646_s15, %s782_s15  }
   0x4   : > { %s671_s21 = sadd.s32 1, %s614_s18   ;;  %s114_s22 = sadd.s32 1, %s610_s17 }
   0x5   : > { %s111_s23 = ssub.s32 %s614_s18, %s671_s21  ;;  %p124_p0 = scmp.ne.s32.totalorder %s610_s17, %s606_s16 }
   0x6   : > { %p112_p1 = scmp.eq.s32.totalorder %s111_s23, 0  ;;  %p125_p2 = scmp.eq.s32.totalorder %s667_s19, 1 }
   0x7   : > { %p130_p3 = scmp.ne.s32.totalorder %s606_s16, %s602_s15  ;;  %p131_p4 = scmp.eq.s32.totalorder %s472_s20, 1 }
   0x8   : > { %s682_s24 = scalar_select %p112_p1, %s610_s17, %s114_s22  }
   0x9   : > { %p684_p5 = por %p125_p2, %p124_p0  ;;  %p688_p6 = por %p131_p4, %p130_p3 }
   0xa   : > { %p474_p7 = scmp.ge.s32.totalorder %s614_s18, 1  ;;  %p158_p8 = scmp.lt.s32.totalorder %s614_s18, 3 }
   0xc   : > { %p159_p9 = pnand %p474_p7, %p158_p8 }
   0xd   : > { %s704_s5 = sshll.u32 (!%p159_p9), %s667_s19, 3  ;;  %s618_s11 = smov (!%p159_p9), 1  }
   0xe   : > { %162 = sbr.rel (%p159_p9) target bundleno = 556 (0x22c), region = 32  ;;  %s191_s6 = sshra.s32 (!%p159_p9), %s704_s5, 3 }
   0xf   : > { %s478_s7 = sshll.u32 (!%p159_p9), %s191_s6, 2  ;;  %s619_s12 = smov (!%p159_p9), 127  }
  0x10   : > { %s194_s10 = scalar_lea.vmem (!%p159_p9), %s775_s0, %s478_s7  ;;  %s198_s20 = scalar_lea.vmem (!%p159_p9), %s777_s2, %s704_s5 }
  0x11   : > { %s180_s22 = sand.u32 (!%p159_p9), 1, %s606_s16   ;;  %s484_s27 = sshll.u32 (!%p159_p9), %s667_s19, 7 }
  0x12   : > { %s475_s23 = sshll.u32 (!%p159_p9), %s180_s22, 3  ;;  %s735_s6 = scalar_lea.hbm (!%p159_p9), %s779_s4, %s484_s27 }
  0x13   : > { %v546_v0 = vld [vmem:[%s775_s0] sm:$0xff]   ;;  %v616_v1 = vmov 0.0   ;;  %vm617_vm0 = vmmov 0   ;;  %vm293_vm1 = vcmask 130048   ;;  %v305_v19 = vlaneseq  ;;  %s182_s28 = scalar_lea.vmem [#allocation2], %s475_s23  ;;  %s381_s7 = scalar_lea.sflag [#allocation3], %s180_s22 }
  0x14   : > { %491 = vmatprep.subr.bf16.mxu0 %v616_v1  ;;  %497 = vmatprep.subr.bf16.mxu1 %v616_v1  ;;  %v547_v2 = vld [vmem:[%s776_s1] sm:$0xff]   ;;  %v307_v21 = vstv %s704_s5  ;;  %s397_s29 = sshll.u32 %s182_s28, 4  ;;  %vm374_vm11 = vcmask 121856   ;;  %s620_s9 = smov [#allocation2]   ;;  %s398_s29 = int_to_ptr.vmem [resolvable:$true] %s397_s29 }
  0x15   : > { %492 = vmatpush3.bf16.xpose.msra.mxu0 %v546_v0  ;;  %493 = vmatprep.mubr.msk.bf16.mxu0 %vm617_vm0, %v616_v1  ;;  %v195_v3 = vld [vmem:[%s194_s10] sm:$0xf]  ;;  %v306_v20 = vshrl.u32 %v305_v19, 7  ;;  %v310_v23 = vand.u32 127, %v305_v19  ;;  %s554_s8 = scalar_lea.vmem %s398_s29, 128  ;;  %s558_s10 = sshll.u32 %s620_s9, 4  ;;  %s559_s10 = int_to_ptr.vmem [resolvable:$false] %s558_s10 }
  0x16   : > { %498 = vmatpush3.bf16.xpose.msra.mxu1 %v547_v2  ;;  %499 = vmatprep.mubr.msk.bf16.mxu1 %vm617_vm0, %v616_v1  ;;  %v199_v16 = vld [vmem:[%s198_s20] sm:$0xff]  ;;  %p555_p10 = scmp.ne.s32.totalorder %s398_s29, %s554_s8  ;;  %p561_p13 = scmp.lt.s32.totalorder %s398_s29, %s559_s10 }
  0x17   : > { %vm330_vm2 = vcmp.gt.f32.partialorder %v199_v16, 0.5  ;;  %v308_v22 = vadd.s32 %v307_v21, %v306_v20 }
  0x18   : > { %p556_p11 = pnand %p555_p10, %p684_p5 }
  0x19   : > { %v311_v24 = vsub.s32 %v308_v22, %v310_v23 }
  0x1a   : > { %p557_p12 = pneg %p556_p11 }
  0x1b   : > { %v313_v25 = vand.u32 7, %v311_v24  ;;  %vm312_vm5 = vcmp.ne.s32.totalorder %v311_v24, 0  ;;  %vm368_vm10 = vcmp.gt.s32.totalorder %v311_v24, 0 }
  0x1c   : > { %494 = vmatmul.mubr.bf16.vlgmr.msra.gmra.mxu0 %v195_v3 }
  0x1d   : > { %500 = vmatmul.mubr.bf16.vlgmr.msra.gmra.mxu1 %v195_v3  ;;  %vm314_vm6 = vcmp.eq.s32.totalorder %v313_v25, 0 }
  0x1e   : > { %vm315_vm7 = vmand %vm312_vm5, %vm314_vm6 }
  0xdc   : > { %v240_v4 = vpop.f32.mrf.mxu0 }
  0xdd   : > { %v292_v5 = vmul.f32 2.0, %v240_v4  ;;  %v286_v6 = vpop.f32.mrf.mxu1 }
  0xde   : > { %v297_v7 = vsel %vm293_vm1, %v286_v6, -inf  ;;  %v495_v8 = vpop.f32.mrf.mxu0  ;;  %v324_v9 = vadd.f32 0.1, %v286_v6  ;;  %v303_v31 = vmul.f32 2.0, %v286_v6 }
  0xdf   : > { %298 = vmax.xlane.f32.xlu0 %v297_v7  ;;  %v501_v10 = vpop.f32.mrf.mxu1  ;;  %v294_v12 = vsel %vm293_vm1, %v292_v5, -inf }
  0xe0   : > { %334 = vrot.lane.b32.xlu1 %v324_v9, %s618_s11  ;;  %v243_v11 = vpop.f32.mrf.mxu0  ;;  %s560_s11 = scalar_lea.vmem %s559_s10, 256 }
  0xe1   : > { %v289_v13 = vpop.f32.mrf.mxu1  ;;  %p562_p0 = scmp.lt.s32.totalorder %s560_s11, %s554_s8 }
  0xe2   : > { %v496_v14 = vpop.f32.mrf.mxu0 }
  0xe3   : > { %v502_v15 = vpop.f32.mrf.mxu1  ;;  %295 = vmax.xlane.f32.xlu0 %v294_v12  ;;  %p563_p1 = por %p562_p0, %p561_p13 }
  0xe5   : > { %p564_p2 = pnand %p563_p1, %p557_p12 }
  0xf9   : > { %326 = vrot.lane.b32.xlu0 %v324_v9, %s619_s12 }
 0x152   : > { %v335_v17 = vpop.permute.xlu1 %334 }
 0x153   : > { %vm337_vm3 = vcmp.le.f32.partialorder %v286_v6, %v335_v17 }
 0x154   : > { %vm338_vm4 = vmand %vm337_vm3, %vm330_vm2 }
 0x155   : > { %v482_v18 = vsel %vm338_vm4, 1.0, %v616_v1 }
 0x156   : > { %355 = vrot.lane.b32.xlu1 %v482_v18, %s619_s12 }
 0x168   : > { %v299_v26 = vpop.xlane.xlu0 %298 }
 0x169   : > { %v300_v27 = vmul.f32 2.0, %v299_v26 }
 0x16c   : > { %v296_v28 = vpop.xlane.xlu0 %295 }
 0x16d   : > { %v301_v29 = vmax.f32 %v296_v28, %v300_v27 }
 0x16f   : > { %v302_v30 = vsub.f32 %v292_v5, %v301_v29  ;;  %v304_v35 = vsub.f32 %v303_v31, %v301_v29 }
 0x170   : > { %v327_v32 = vpop.permute.xlu0 %326 }
 0x171   : > { %v316_v33 = vmul.f32 1.442695, %v302_v30  ;;  %vm329_vm8 = vcmp.le.f32.partialorder %v286_v6, %v327_v32  ;;  %v341_v34 = vsel %vm315_vm7, %v302_v30, 0.0  ;;  %v347_v42 = vmul.f32 %v482_v18, %v304_v35 }
 0x172   : > { %vm331_vm9 = vmand %vm329_vm8, %vm330_vm2  ;;  %v342_v36 = vsel %vm293_vm1, %v341_v34, 0.0 }
 0x173   : > { %548 = vpow2.f32 %v316_v33  ;;  %v481_v37 = vsel %vm331_vm9, 1.0, %v616_v1  ;;  %343 = vadd.xlane.f32.xlu0 %v342_v36 }
 0x174   : > { %v345_v38 = vmul.f32 %v481_v37, %v304_v35 }
 0x180   : > { %v549_v39 = vpop.eup %548 }
 0x181   : > { %v318_v40 = vsel %vm312_vm5, %v549_v39, 0.0 }
 0x182   : > { %v319_v41 = vsel %vm293_vm1, %v318_v40, 0.0 }
 0x183   : > { %320 = vadd.xlane.f32.xlu1 %v319_v41 }
 0x189   : > { %370 = vrot.lane.b32.xlu0 %v549_v39, %s619_s12 }
 0x194   : > { %349 = vrot.lane.b32.xlu1 %v347_v42, %s619_s12 }
 0x1fc   : > { %v344_v43 = vpop.xlane.xlu0 %343 }
 0x200   : > { %v371_v44 = vpop.permute.xlu0 %370 }
 0x201   : > { %v373_v45 = vsel %vm368_vm10, %v549_v39, %v371_v44 }
 0x202   : > { %375 = vst.msk [vmem:[%s182_s28] sm:$0xff] %vm374_vm11, %v373_v45 }
 0x203   : > { %567 = shalt.err (!%p564_p2)
}
 0x204   : > { %s568_s12 = scalar_lea.hbm %s735_s6, 128  ;;  %s572_s20 = scalar_lea.hbm %s779_s4, 256 }
 0x205   : > { %p569_p3 = scmp.ne.s32.totalorder %s735_s6, %s568_s12  ;;  %p573_p8 = scmp.lt.s32.totalorder %s735_s6, %s779_s4 }
 0x206   : > { %p574_p9 = scmp.lt.s32.totalorder %s572_s20, %s568_s12 }
 0x207   : > { %p570_p4 = pnand %p569_p3, %p684_p5 }
 0x208   : > { %p575_p10 = por %p574_p9, %p573_p8 }
 0x209   : > { %p571_p7 = pneg %p570_p4 }
 0x20b   : > { %p576_p11 = pnand %p575_p10, %p571_p7 }
 0x20d   : > { %579 = shalt.err (!%p576_p11)
}
 0x20e   : > { %503 = dma.vmem_to_hbm [thread:$0]  (%p684_p5), %s398_s29, 128, %s735_s6, %s381_s7   ;;  %v356_v46 = vpop.permute.xlu1 %355  ;;  %v353_v47 = vadd.f32 1.0, %v481_v37  ;;  %v346_v53 = vadd.f32 %v345_v38, %v344_v43  ;;  %vm366_vm13 = vcmask 7168  }
 0x20f   : > { %p183_p12 = scmp.lt.s32.totalorder %s667_s19, 1 }
 0x210   : > { %v358_v48 = vadd.f32 %v356_v46, %v353_v47 }
 0x211   : > { %s787_s19 = smov (!%p183_p12, %s667_s19), 1 }
 0x212   : > { %v321_v49 = vpop.xlane.xlu1 %320  ;;  %vm359_vm12 = vcmp.lt.f32.partialorder %v358_v48, 1e-06  ;;  %s476_s25 = sshll.u32 %s787_s19, 3 }
 0x213   : > { %550 = vlog2.f32 %v321_v49  ;;  %v360_v50 = vsel %vm359_vm12, 1.0, %v358_v48  ;;  %s186_s29 = scalar_lea.vmem %s778_s3, %s476_s25 }
 0x214   : > { %552 = vrcp.f32 %v360_v50 }
 0x216   : > { %v350_v52 = vpop.permute.xlu1 %349 }
 0x217   : > { %v352_v55 = vadd.f32 %v350_v52, %v346_v53 }
 0x220   : > { %v551_v51 = vpop.eup %550 }
 0x221   : > { %v323_v54 = vmul.f32 0.6931472, %v551_v51  ;;  %v553_v58 = vpop.eup %552 }
 0x223   : > { %v361_v56 = vmul.f32 %v358_v48, %v323_v54 }
 0x225   : > { %v362_v57 = vsub.f32 %v352_v55, %v361_v56 }
 0x227   : > { %v364_v59 = vmul.f32 %v553_v58, %v362_v57 }
 0x229   : > { %v365_v60 = vmul.f32 -7.142857, %v364_v59 }
 0x22b   : > { %367 = vst.msk [vmem:[%s186_s29] sm:$0xff] %vm366_vm13, %v365_v60 }
 0x22c PF: > { %p509_p5 = scmp.ge.s32.totalorder %s614_s18, 2  ;;  %s416_s30 = sand.u32 1, %s602_s15  }
 0x22d   : > { %s417_s19 = scalar_lea.sflag [#allocation3], %s416_s30 }
 0x22e   : > { %p506_p13 = pnand %p509_p5, %p688_p6 }
 0x230   : > { %p507_p0 = pneg %p506_p13 }
 0x232   : > { %597 = dma.done.wait (%p507_p0), %s417_s19, 128  }
 0x233   : > { %599 = vsyncadd (%p507_p0), %s417_s19, 4294967168  ;;  %p15_p1 = scmp.ge.s32.totalorder %s671_s21, 4   ;;  %s782_s15 = smov %s606_s16 }
 0x234   : > { %s783_s16 = smov %s610_s17  ;;  %s784_s17 = smov %s682_s24 }
 0x235   : > { %s785_s18 = smov %s671_s21  ;;  %17 = sbr.rel (!%p15_p1) target bundleno = 3 (0x3), region = 78 }
 0x23a   :  { %422 = vsyncpa [#allocation3], 1 }
 0x23b   :  { %424 = vsyncpa [#allocation3 + $0x1], 1 }

// kernel: tpu_custom_call.1
= control target key start
LH: loop header
LB: loop body
LE: loop exit
PB: predicated region body
PF: predicated region fallthrough
CT: control target
= control target key end

     0   :  { %10 = vsyncpa [#allocation3], 0  ;;  %s775_s0 = inlined_call_operand.vmem [shape: bf16[16,128], index: 0, kind: input, shape index: {}]   ;;  %s776_s1 = inlined_call_operand.vmem [shape: bf16[16,128], index: 1, kind: input, shape index: {}]   ;;  %s777_s2 = inlined_call_operand.vmem [shape: f32[16,2], index: 2, kind: input, shape index: {}]   ;;  %s778_s3 = inlined_call_operand.vmem [shape: f32[16,1], index: 3, kind: output, shape index: {0}]   ;;  %s779_s4 = inlined_call_operand.hbm [shape: f32[16,15], index: 4, kind: output, shape index: {1}]  }
   0x1   :  { %12 = vsyncpa [#allocation3 + $0x1], 0  ;;  %s646_s15 = smov 0   ;;  %s648_s16 = smov 0  }
   0x2   :  { %s650_s17 = smov 0   ;;  %s652_s18 = smov 0  }
   0x3 LB: > { %s667_s19 = sadd.s32 4294967295, %s614_s18   ;;  %s472_s20 = sadd.s32 4294967294, %s614_s18   ;;  %s614_s18 = sphi %s652_s18, %s785_s18   ;;  %s610_s17 = sphi %s650_s17, %s784_s17   ;;  %s606_s16 = sphi %s648_s16, %s783_s16   ;;  %s602_s15 = sphi %s646_s15, %s782_s15  }
   0x4   : > { %s671_s21 = sadd.s32 1, %s614_s18   ;;  %s114_s22 = sadd.s32 1, %s610_s17 }
   0x5   : > { %s111_s23 = ssub.s32 %s614_s18, %s671_s21  ;;  %p124_p0 = scmp.ne.s32.totalorder %s610_s17, %s606_s16 }
   0x6   : > { %p112_p1 = scmp.eq.s32.totalorder %s111_s23, 0  ;;  %p125_p2 = scmp.eq.s32.totalorder %s667_s19, 1 }
   0x7   : > { %p130_p3 = scmp.ne.s32.totalorder %s606_s16, %s602_s15  ;;  %p131_p4 = scmp.eq.s32.totalorder %s472_s20, 1 }
   0x8   : > { %s682_s24 = scalar_select %p112_p1, %s610_s17, %s114_s22  }
   0x9   : > { %p684_p5 = por %p125_p2, %p124_p0  ;;  %p688_p6 = por %p131_p4, %p130_p3 }
   0xa   : > { %p474_p7 = scmp.ge.s32.totalorder %s614_s18, 1  ;;  %p158_p8 = scmp.lt.s32.totalorder %s614_s18, 3 }
   0xc   : > { %p159_p9 = pnand %p474_p7, %p158_p8 }
   0xd   : > { %s704_s5 = sshll.u32 (!%p159_p9), %s667_s19, 3  ;;  %s618_s11 = smov (!%p159_p9), 1  }
   0xe   : > { %162 = sbr.rel (%p159_p9) target bundleno = 556 (0x22c), region = 32  ;;  %s191_s6 = sshra.s32 (!%p159_p9), %s704_s5, 3 }
   0xf   : > { %s478_s7 = sshll.u32 (!%p159_p9), %s191_s6, 2  ;;  %s619_s12 = smov (!%p159_p9), 127  }
  0x10   : > { %s194_s10 = scalar_lea.vmem (!%p159_p9), %s775_s0, %s478_s7  ;;  %s198_s20 = scalar_lea.vmem (!%p159_p9), %s777_s2, %s704_s5 }
  0x11   : > { %s180_s22 = sand.u32 (!%p159_p9), 1, %s606_s16   ;;  %s484_s27 = sshll.u32 (!%p159_p9), %s667_s19, 7 }
  0x12   : > { %s475_s23 = sshll.u32 (!%p159_p9), %s180_s22, 3  ;;  %s735_s6 = scalar_lea.hbm (!%p159_p9), %s779_s4, %s484_s27 }
  0x13   : > { %v546_v0 = vld [vmem:[%s775_s0] sm:$0xff]   ;;  %v616_v1 = vmov 0.0   ;;  %vm617_vm0 = vmmov 0   ;;  %vm293_vm1 = vcmask 130048   ;;  %v305_v19 = vlaneseq  ;;  %s182_s28 = scalar_lea.vmem [#allocation2], %s475_s23  ;;  %s381_s7 = scalar_lea.sflag [#allocation3], %s180_s22 }
  0x14   : > { %491 = vmatprep.subr.bf16.mxu0 %v616_v1  ;;  %497 = vmatprep.subr.bf16.mxu1 %v616_v1  ;;  %v547_v2 = vld [vmem:[%s776_s1] sm:$0xff]   ;;  %v307_v21 = vstv %s704_s5  ;;  %s397_s29 = sshll.u32 %s182_s28, 4  ;;  %vm374_vm11 = vcmask 121856   ;;  %s620_s9 = smov [#allocation2]   ;;  %s398_s29 = int_to_ptr.vmem [resolvable:$true] %s397_s29 }
  0x15   : > { %492 = vmatpush3.bf16.xpose.msra.mxu0 %v546_v0  ;;  %493 = vmatprep.mubr.msk.bf16.mxu0 %vm617_vm0, %v616_v1  ;;  %v195_v3 = vld [vmem:[%s194_s10] sm:$0xf]  ;;  %v306_v20 = vshrl.u32 %v305_v19, 7  ;;  %v310_v23 = vand.u32 127, %v305_v19  ;;  %s554_s8 = scalar_lea.vmem %s398_s29, 128  ;;  %s558_s10 = sshll.u32 %s620_s9, 4  ;;  %s559_s10 = int_to_ptr.vmem [resolvable:$false] %s558_s10 }
  0x16   : > { %498 = vmatpush3.bf16.xpose.msra.mxu1 %v547_v2  ;;  %499 = vmatprep.mubr.msk.bf16.mxu1 %vm617_vm0, %v616_v1  ;;  %v199_v16 = vld [vmem:[%s198_s20] sm:$0xff]  ;;  %p555_p10 = scmp.ne.s32.totalorder %s398_s29, %s554_s8  ;;  %p561_p13 = scmp.lt.s32.totalorder %s398_s29, %s559_s10 }
  0x17   : > { %vm330_vm2 = vcmp.gt.f32.partialorder %v199_v16, 0.5  ;;  %v308_v22 = vadd.s32 %v307_v21, %v306_v20 }
  0x18   : > { %p556_p11 = pnand %p555_p10, %p684_p5 }
  0x19   : > { %v311_v24 = vsub.s32 %v308_v22, %v310_v23 }
  0x1a   : > { %p557_p12 = pneg %p556_p11 }
  0x1b   : > { %v313_v25 = vand.u32 7, %v311_v24  ;;  %vm312_vm5 = vcmp.ne.s32.totalorder %v311_v24, 0  ;;  %vm368_vm10 = vcmp.gt.s32.totalorder %v311_v24, 0 }
  0x1c   : > { %494 = vmatmul.mubr.bf16.vlgmr.msra.gmra.mxu0 %v195_v3 }
  0x1d   : > { %500 = vmatmul.mubr.bf16.vlgmr.msra.gmra.mxu1 %v195_v3  ;;  %vm314_vm6 = vcmp.eq.s32.totalorder %v313_v25, 0 }
  0x1e   : > { %vm315_vm7 = vmand %vm312_vm5, %vm314_vm6 }
  0xdc   : > { %v240_v4 = vpop.f32.mrf.mxu0 }
  0xdd   : > { %v292_v5 = vmul.f32 2.0, %v240_v4  ;;  %v286_v6 = vpop.f32.mrf.mxu1 }
  0xde   : > { %v297_v7 = vsel %vm293_vm1, %v286_v6, -inf  ;;  %v495_v8 = vpop.f32.mrf.mxu0  ;;  %v324_v9 = vadd.f32 0.1, %v286_v6  ;;  %v303_v31 = vmul.f32 2.0, %v286_v6 }
  0xdf   : > { %298 = vmax.xlane.f32.xlu0 %v297_v7  ;;  %v501_v10 = vpop.f32.mrf.mxu1  ;;  %v294_v12 = vsel %vm293_vm1, %v292_v5, -inf }
  0xe0   : > { %334 = vrot.lane.b32.xlu1 %v324_v9, %s618_s11  ;;  %v243_v11 = vpop.f32.mrf.mxu0  ;;  %s560_s11 = scalar_lea.vmem %s559_s10, 256 }
  0xe1   : > { %v289_v13 = vpop.f32.mrf.mxu1  ;;  %p562_p0 = scmp.lt.s32.totalorder %s560_s11, %s554_s8 }
  0xe2   : > { %v496_v14 = vpop.f32.mrf.mxu0 }
  0xe3   : > { %v502_v15 = vpop.f32.mrf.mxu1  ;;  %295 = vmax.xlane.f32.xlu0 %v294_v12  ;;  %p563_p1 = por %p562_p0, %p561_p13 }
  0xe5   : > { %p564_p2 = pnand %p563_p1, %p557_p12 }
  0xf9   : > { %326 = vrot.lane.b32.xlu0 %v324_v9, %s619_s12 }
 0x152   : > { %v335_v17 = vpop.permute.xlu1 %334 }
 0x153   : > { %vm337_vm3 = vcmp.le.f32.partialorder %v286_v6, %v335_v17 }
 0x154   : > { %vm338_vm4 = vmand %vm337_vm3, %vm330_vm2 }
 0x155   : > { %v482_v18 = vsel %vm338_vm4, 1.0, %v616_v1 }
 0x156   : > { %355 = vrot.lane.b32.xlu1 %v482_v18, %s619_s12 }
 0x168   : > { %v299_v26 = vpop.xlane.xlu0 %298 }
 0x169   : > { %v300_v27 = vmul.f32 2.0, %v299_v26 }
 0x16c   : > { %v296_v28 = vpop.xlane.xlu0 %295 }
 0x16d   : > { %v301_v29 = vmax.f32 %v296_v28, %v300_v27 }
 0x16f   : > { %v302_v30 = vsub.f32 %v292_v5, %v301_v29  ;;  %v304_v35 = vsub.f32 %v303_v31, %v301_v29 }
 0x170   : > { %v327_v32 = vpop.permute.xlu0 %326 }
 0x171   : > { %v316_v33 = vmul.f32 1.442695, %v302_v30  ;;  %vm329_vm8 = vcmp.le.f32.partialorder %v286_v6, %v327_v32  ;;  %v341_v34 = vsel %vm315_vm7, %v302_v30, 0.0  ;;  %v347_v42 = vmul.f32 %v482_v18, %v304_v35 }
 0x172   : > { %vm331_vm9 = vmand %vm329_vm8, %vm330_vm2  ;;  %v342_v36 = vsel %vm293_vm1, %v341_v34, 0.0 }
 0x173   : > { %548 = vpow2.f32 %v316_v33  ;;  %v481_v37 = vsel %vm331_vm9, 1.0, %v616_v1  ;;  %343 = vadd.xlane.f32.xlu0 %v342_v36 }
 0x174   : > { %v345_v38 = vmul.f32 %v481_v37, %v304_v35 }
 0x180   : > { %v549_v39 = vpop.eup %548 }
 0x181   : > { %v318_v40 = vsel %vm312_vm5, %v549_v39, 0.0 }
 0x182   : > { %v319_v41 = vsel %vm293_vm1, %v318_v40, 0.0 }
 0x183   : > { %320 = vadd.xlane.f32.xlu1 %v319_v41 }
 0x189   : > { %370 = vrot.lane.b32.xlu0 %v549_v39, %s619_s12 }
 0x194   : > { %349 = vrot.lane.b32.xlu1 %v347_v42, %s619_s12 }
 0x1fc   : > { %v344_v43 = vpop.xlane.xlu0 %343 }
 0x200   : > { %v371_v44 = vpop.permute.xlu0 %370 }
 0x201   : > { %v373_v45 = vsel %vm368_vm10, %v549_v39, %v371_v44 }
 0x202   : > { %375 = vst.msk [vmem:[%s182_s28] sm:$0xff] %vm374_vm11, %v373_v45 }
 0x203   : > { %567 = shalt.err (!%p564_p2)
}
 0x204   : > { %s568_s12 = scalar_lea.hbm %s735_s6, 128  ;;  %s572_s20 = scalar_lea.hbm %s779_s4, 256 }
 0x205   : > { %p569_p3 = scmp.ne.s32.totalorder %s735_s6, %s568_s12  ;;  %p573_p8 = scmp.lt.s32.totalorder %s735_s6, %s779_s4 }
 0x206   : > { %p574_p9 = scmp.lt.s32.totalorder %s572_s20, %s568_s12 }
 0x207   : > { %p570_p4 = pnand %p569_p3, %p684_p5 }
 0x208   : > { %p575_p10 = por %p574_p9, %p573_p8 }
 0x209   : > { %p571_p7 = pneg %p570_p4 }
 0x20b   : > { %p576_p11 = pnand %p575_p10, %p571_p7 }
 0x20d   : > { %579 = shalt.err (!%p576_p11)
}
 0x20e   : > { %503 = dma.vmem_to_hbm [thread:$0]  (%p684_p5), %s398_s29, 128, %s735_s6, %s381_s7   ;;  %v356_v46 = vpop.permute.xlu1 %355  ;;  %v353_v47 = vadd.f32 1.0, %v481_v37  ;;  %v346_v53 = vadd.f32 %v345_v38, %v344_v43  ;;  %vm366_vm13 = vcmask 7168  }
 0x20f   : > { %p183_p12 = scmp.lt.s32.totalorder %s667_s19, 1 }
 0x210   : > { %v358_v48 = vadd.f32 %v356_v46, %v353_v47 }
 0x211   : > { %s787_s19 = smov (!%p183_p12, %s667_s19), 1 }
 0x212   : > { %v321_v49 = vpop.xlane.xlu1 %320  ;;  %vm359_vm12 = vcmp.lt.f32.partialorder %v358_v48, 1e-06  ;;  %s476_s25 = sshll.u32 %s787_s19, 3 }
 0x213   : > { %550 = vlog2.f32 %v321_v49  ;;  %v360_v50 = vsel %vm359_vm12, 1.0, %v358_v48  ;;  %s186_s29 = scalar_lea.vmem %s778_s3, %s476_s25 }
 0x214   : > { %552 = vrcp.f32 %v360_v50 }
 0x216   : > { %v350_v52 = vpop.permute.xlu1 %349 }
 0x217   : > { %v352_v55 = vadd.f32 %v350_v52, %v346_v53 }
 0x220   : > { %v551_v51 = vpop.eup %550 }
 0x221   : > { %v323_v54 = vmul.f32 0.6931472, %v551_v51  ;;  %v553_v58 = vpop.eup %552 }
 0x223   : > { %v361_v56 = vmul.f32 %v358_v48, %v323_v54 }
 0x225   : > { %v362_v57 = vsub.f32 %v352_v55, %v361_v56 }
 0x227   : > { %v364_v59 = vmul.f32 %v553_v58, %v362_v57 }
 0x229   : > { %v365_v60 = vmul.f32 -7.142857, %v364_v59 }
 0x22b   : > { %367 = vst.msk [vmem:[%s186_s29] sm:$0xff] %vm366_vm13, %v365_v60 }
 0x22c PF: > { %p509_p5 = scmp.ge.s32.totalorder %s614_s18, 2  ;;  %s416_s30 = sand.u32 1, %s602_s15  }
 0x22d   : > { %s417_s19 = scalar_lea.sflag [#allocation3], %s416_s30 }
 0x22e   : > { %p506_p13 = pnand %p509_p5, %p688_p6 }
 0x230   : > { %p507_p0 = pneg %p506_p13 }
 0x232   : > { %597 = dma.done.wait (%p507_p0), %s417_s19, 128  }
 0x233   : > { %599 = vsyncadd (%p507_p0), %s417_s19, 4294967168  ;;  %p15_p1 = scmp.ge.s32.totalorder %s671_s21, 4   ;;  %s782_s15 = smov %s606_s16 }
 0x234   : > { %s783_s16 = smov %s610_s17  ;;  %s784_s17 = smov %s682_s24 }
 0x235   : > { %s785_s18 = smov %s671_s21  ;;  %17 = sbr.rel (!%p15_p1) target bundleno = 3 (0x3), region = 78 }
 0x23a   :  { %422 = vsyncpa [#allocation3], 1 }
 0x23b   :  { %424 = vsyncpa [#allocation3 + $0x1], 1 }

</bundles_post_ra>
